<compile_context>
chip_gen: v5e
topology: v5e:2x2
jax: 0.10.0
libtpu: 0.0.40
codegen_flags: <defaults>
</compile_context>

<pallas_src>
import functools

import jax
import jax.numpy as jnp
from jax.experimental import pallas as pl
from jax.experimental.pallas import tpu as pltpu

_LANES = 128
_SUBLANES = 8
_TILE_ROWS = 2048  # 2048 rows * 128 lanes * 4 B = 1 MiB per f32 input block


def _charbonnier_kernel(x_ref, y_ref, o_ref, *, eps, rows, block_rows, needs_mask):
    # Elementwise Charbonnier on one (block_rows, 128) tile, folded to a
    # per-block (8, 128) partial sum (plain vector adds across vregs).
    x = x_ref[...].astype(jnp.float32)
    y = y_ref[...].astype(jnp.float32)
    d = x - y
    val = jnp.sqrt(d * d + jnp.float32(eps * eps))

    if needs_mask:
        # The last grid block may extend past the real row count; zero the
        # out-of-bounds rows (their VMEM contents are undefined).
        start = pl.program_id(0) * block_rows
        row_ids = start + jax.lax.broadcasted_iota(
            jnp.int32, (block_rows, _LANES), 0
        )
        val = jnp.where(row_ids < rows, val, jnp.float32(0.0))

    folded = val.reshape(block_rows // _SUBLANES, _SUBLANES, _LANES).sum(axis=0)
    o_ref[0] = folded


def charbonnier_loss(x, y, eps=1e-06):
    assert x.shape == y.shape and x.ndim == 5, "expected matching 5-D NCTHW inputs"
    b, c, t, h, w = y.shape
    n = b * c * t * h * w

    xf = jnp.reshape(x, (-1,))
    yf = jnp.reshape(y, (-1,))

    # Largest prefix whose length is a multiple of one (8, 128) vreg goes through
    # the kernel via a free reshape (no pad / cast copies in the wrapper).
    vreg = _SUBLANES * _LANES
    n_main = (n // vreg) * vreg

    total = jnp.float32(0.0)

    if n_main > 0:
        rows = n_main // _LANES  # always a multiple of 8 by construction
        if n_main == n:
            x2 = jnp.reshape(xf, (rows, _LANES))
            y2 = jnp.reshape(yf, (rows, _LANES))
        else:
            # TODO(synk): ragged fallback — the prefix slice materializes one copy.
            x2 = jnp.reshape(xf[:n_main], (rows, _LANES))
            y2 = jnp.reshape(yf[:n_main], (rows, _LANES))

        block_rows = min(_TILE_ROWS, rows)
        num_blocks = -(-rows // block_rows)
        needs_mask = (rows % block_rows) != 0

        partials = pl.pallas_call(
            functools.partial(
                _charbonnier_kernel,
                eps=float(eps),
                rows=rows,
                block_rows=block_rows,
                needs_mask=needs_mask,
            ),
            out_shape=jax.ShapeDtypeStruct(
                (num_blocks, _SUBLANES, _LANES), jnp.float32
            ),
            grid_spec=pltpu.PrefetchScalarGridSpec(
                num_scalar_prefetch=0,
                grid=(num_blocks,),
                in_specs=[
                    pl.BlockSpec((block_rows, _LANES), lambda i: (i, 0)),
                    pl.BlockSpec((block_rows, _LANES), lambda i: (i, 0)),
                ],
                out_specs=pl.BlockSpec((1, _SUBLANES, _LANES), lambda i: (i, 0, 0)),
            ),
            compiler_params=pltpu.CompilerParams(
                dimension_semantics=("parallel",),
            ),
        )(x2, y2)
        total = total + jnp.sum(partials, dtype=jnp.float32)

    if n_main != n:
        # Tiny tail (< 1024 elements): handled directly in JAX.
        xt = xf[n_main:].astype(jnp.float32)
        yt = yf[n_main:].astype(jnp.float32)
        dt = xt - yt
        total = total + jnp.sum(jnp.sqrt(dt * dt + jnp.float32(eps * eps)))

    return total / jnp.float32(c * b * h * w * t)


def _reference(x, y, eps=1e-06):
    b, c, t, h, w = y.shape
    xd = x.astype(jnp.float32)
    yd = y.astype(jnp.float32)
    loss = jnp.sum(jnp.sqrt((xd - yd) ** 2 + eps ** 2))
    return loss / (c * b * h * w * t)


if __name__ == "__main__":
    key = jax.random.PRNGKey(0)
    kx, ky = jax.random.split(key)
    # Small 5-D shapes consistent with the module's (b, c, t, h, w) inputs.
    shape = (2, 4, 3, 16, 16)
    x = jax.random.normal(kx, shape, dtype=jnp.float32)
    y = jax.random.normal(ky, shape, dtype=jnp.float32)

    out = charbonnier_loss(x, y)
    out = jax.block_until_ready(out)

    ref = _reference(x, y)
    assert jnp.allclose(out, ref, rtol=1e-5, atol=1e-6), (out, ref)
    print("KERNEL_OK")
</pallas_src>

<mosaic_0001>
module attributes {stable_mosaic.version = 11 : i64} {
  func.func @_charbonnier_kernel(%arg0: i32, %arg1: memref<48x128xf32, #tpu.memory_space<vmem>>, %arg2: memref<48x128xf32, #tpu.memory_space<vmem>>, %arg3: memref<1x8x128xf32, #tpu.memory_space<vmem>>) attributes {dimension_semantics = [#tpu.dimension_semantics<parallel>], iteration_bounds = array<i64: 1>, scalar_prefetch = 0 : i64, scratch_operands = 0 : i64, tpu.core_type = #tpu.core_type<tc>, window_params = [{transform_indices = @transform_0, window_bounds = array<i64: 48, 128>}, {transform_indices = @transform_1, window_bounds = array<i64: 48, 128>}, {transform_indices = @transform_2, window_bounds = array<i64: 1, 8, 128>}]} {
    %c0 = arith.constant 0 : index
    %c0_0 = arith.constant 0 : index
    %0 = vector.load %arg1[%c0, %c0_0] : memref<48x128xf32, #tpu.memory_space<vmem>>, vector<48x128xf32>
    %c0_1 = arith.constant 0 : index
    %c0_2 = arith.constant 0 : index
    %1 = vector.load %arg2[%c0_1, %c0_2] : memref<48x128xf32, #tpu.memory_space<vmem>>, vector<48x128xf32>
    %2 = arith.subf %0, %1 : vector<48x128xf32>
    %3 = arith.mulf %2, %2 : vector<48x128xf32>
    %cst = arith.constant 9.99999996E-13 : f32
    %4 = vector.broadcast %cst : f32 to vector<48x128xf32>
    %5 = arith.addf %3, %4 : vector<48x128xf32>
    %6 = math.sqrt %5 : vector<48x128xf32>
    %7 = vector.shape_cast %6 : vector<48x128xf32> to vector<6x8x128xf32>
    %cst_3 = arith.constant dense<0.000000e+00> : vector<8x128xf32>
    %8 = vector.multi_reduction <add>, %7, %cst_3 [0] : vector<6x8x128xf32> to vector<8x128xf32>
    %c0_4 = arith.constant 0 : index
    %c0_5 = arith.constant 0 : index
    %c0_6 = arith.constant 0 : index
    %9 = vector.load %arg3[%c0_4, %c0_5, %c0_6] : memref<1x8x128xf32, #tpu.memory_space<vmem>>, vector<1x8x128xf32>
    %10 = vector.shape_cast %9 : vector<1x8x128xf32> to vector<8x128xf32>
    %11 = vector.shape_cast %8 : vector<8x128xf32> to vector<1x8x128xf32>
    tpu.vector_store %arg3[%c0_4, %c0_5, %c0_6], %11 {strides = array<i32>} : memref<1x8x128xf32, #tpu.memory_space<vmem>>, vector<1x8x128xf32>,
    return
  }
  func.func @transform_0(%arg0: i32) -> (i32, i32) {
    %c0_i32 = arith.constant 0 : i32
    %c0_i32_0 = arith.constant 0 : i32
    return %arg0, %c0_i32 : i32, i32
  }
  func.func @transform_1(%arg0: i32) -> (i32, i32) {
    %c0_i32 = arith.constant 0 : i32
    %c0_i32_0 = arith.constant 0 : i32
    return %arg0, %c0_i32 : i32, i32
  }
  func.func @transform_2(%arg0: i32) -> (i32, i32, i32) {
    %c0_i32 = arith.constant 0 : i32
    %c0_i32_0 = arith.constant 0 : i32
    %c0_i32_1 = arith.constant 0 : i32
    return %arg0, %c0_i32, %c0_i32_0 : i32, i32, i32
  }
}

</mosaic_0001>

<bundles_post_ra>
// kernel: tpu_custom_call.1
= control target key start
LH: loop header
LB: loop body
LE: loop exit
PB: predicated region body
PF: predicated region fallthrough
CT: control target
= control target key end

     0   :  { %7 = vsyncpa [#allocation3], 0  ;;  %s368_s0 = inlined_call_operand.hbm [shape: f32[48,128], index: 0, kind: input, shape index: {}]   ;;  %s369_s1 = inlined_call_operand.hbm [shape: f32[48,128], index: 1, kind: input, shape index: {}]   ;;  %s370_s2 = inlined_call_operand.hbm [shape: f32[1,8,128], index: 2, kind: output, shape index: {}]  }
   0x1   :  { %8 = vsyncpa [#allocation6], 0 }
   0x2   :  { %9 = vsyncpa [#allocation4], 0  ;;  %s14_s11 = sshll.u32 %s368_s0, 4  ;;  %s265_s12 = smov [#allocation2]   ;;  %s15_s11 = int_to_ptr.hbm [resolvable:$true] %s14_s11 }
   0x3   :  { %s16_s13 = sshll.u32 %s265_s12, 4  ;;  %s27_s16 = sshll.u32 %s369_s1, 4  ;;  %s17_s13 = int_to_ptr.vmem [resolvable:$true] %s16_s13  ;;  %s28_s16 = int_to_ptr.hbm [resolvable:$true] %s27_s16 }
   0x4   :  { %s266_s17 = smov 128   ;;  %s267_s18 = smov 8  }
   0x5   :  { %22 = dma.hbm_to_vmem [thread:$0]  %s15_s11, 768, %s17_s13, [#allocation3], %s266_s17, %s266_s17, %s267_s18  }
   0x6   :  { %s268_s19 = smov [#allocation5]  }
   0x7   :  { %s29_s20 = sshll.u32 %s268_s19, 4  ;;  %s30_s20 = int_to_ptr.vmem [resolvable:$true] %s29_s20 }
   0x8   :  { %35 = dma.hbm_to_vmem [thread:$0]  %s28_s16, 768, %s30_s20, [#allocation6], %s266_s17, %s266_s17, %s267_s18  }
   0x9   :  { %259 = dma.done.wait [#allocation3], 768  }
   0xa   :  { %260 = vsyncadd [#allocation3], 4294966528 }
   0xb   :  { %261 = dma.done.wait [#allocation6], 768  }
   0xc   :  { %262 = vsyncadd [#allocation6], 4294966528  ;;  %v44_v0 = vld [vmem:[#allocation2] sm:$0xff]  ;;  %v45_v1 = vld [vmem:[#allocation2 + $0x8] sm:$0xff]  ;;  %s269_s0 = smov [#allocation7]   ;;  %s159_s23 = sshll.u32 %s370_s2, 4  ;;  %s160_s23 = int_to_ptr.hbm [resolvable:$true] %s159_s23 }
   0xd   :  { %v46_v2 = vld [vmem:[#allocation2 + $0x10] sm:$0xff]  ;;  %v47_v3 = vld [vmem:[#allocation2 + $0x18] sm:$0xff]  ;;  %v48_v4 = vld [vmem:[#allocation2 + $0x20] sm:$0xff]  ;;  %s157_s1 = sshll.u32 %s269_s0, 4  ;;  %s158_s1 = int_to_ptr.vmem [resolvable:$true] %s157_s1 }
   0xe   :  { %v49_v5 = vld [vmem:[#allocation2 + $0x28] sm:$0xff]  ;;  %v50_v6 = vld [vmem:[#allocation5] sm:$0xff]  ;;  %v51_v7 = vld [vmem:[#allocation5 + $0x8] sm:$0xff] }
   0xf   :  { %v52_v8 = vld [vmem:[#allocation5 + $0x10] sm:$0xff]  ;;  %v53_v9 = vld [vmem:[#allocation5 + $0x18] sm:$0xff]  ;;  %v54_v10 = vld [vmem:[#allocation5 + $0x20] sm:$0xff]  ;;  %v56_v12 = vsub.f32 %v44_v0, %v50_v6  ;;  %v57_v13 = vsub.f32 %v45_v1, %v51_v7 }
  0x10   :  { %v55_v11 = vld [vmem:[#allocation5 + $0x28] sm:$0xff]  ;;  %v58_v14 = vsub.f32 %v46_v2, %v52_v8  ;;  %v59_v15 = vsub.f32 %v47_v3, %v53_v9  ;;  %v60_v16 = vsub.f32 %v48_v4, %v54_v10 }
  0x11   :  { %v61_v17 = vsub.f32 %v49_v5, %v55_v11  ;;  %v62_v18 = vmul.f32 %v56_v12, %v56_v12  ;;  %v63_v19 = vmul.f32 %v57_v13, %v57_v13 }
  0x12   :  { %v64_v20 = vmul.f32 %v58_v14, %v58_v14  ;;  %v65_v21 = vmul.f32 %v59_v15, %v59_v15  ;;  %v66_v22 = vmul.f32 %v60_v16, %v60_v16 }
  0x13   :  { %v67_v23 = vmul.f32 %v61_v17, %v61_v17  ;;  %v291_v24 = vadd.f32 1e-12, %v62_v18  ;;  %v293_v25 = vadd.f32 1e-12, %v63_v19 }
  0x14   :  { %v295_v26 = vadd.f32 1e-12, %v64_v20  ;;  %v297_v27 = vadd.f32 1e-12, %v65_v21  ;;  %v299_v28 = vadd.f32 1e-12, %v66_v22 }
  0x15   :  { %175 = vrsqrt.f32 %v291_v24  ;;  %v302_v29 = vadd.f32 1e-12, %v67_v23  ;;  %vm81_vm0 = vcmp.eq.f32.partialorder %v291_v24, inf  ;;  %vm83_vm1 = vcmp.eq.f32.partialorder %v291_v24, 0.0 }
  0x16   :  { %177 = vrsqrt.f32 %v293_v25  ;;  %v84_v37 = vand.u32 2147483648, %v291_v24  ;;  %vm93_vm2 = vcmp.eq.f32.partialorder %v293_v25, inf  ;;  %vm95_vm3 = vcmp.eq.f32.partialorder %v293_v25, 0.0 }
  0x17   :  { %179 = vrsqrt.f32 %v295_v26  ;;  %v96_v41 = vand.u32 2147483648, %v293_v25  ;;  %vm105_vm4 = vcmp.eq.f32.partialorder %v295_v26, inf  ;;  %vm107_vm5 = vcmp.eq.f32.partialorder %v295_v26, 0.0 }
  0x18   :  { %181 = vrsqrt.f32 %v297_v27  ;;  %v108_v52 = vand.u32 2147483648, %v295_v26  ;;  %vm117_vm6 = vcmp.eq.f32.partialorder %v297_v27, inf  ;;  %vm119_vm7 = vcmp.eq.f32.partialorder %v297_v27, 0.0 }
  0x19   :  { %183 = vrsqrt.f32 %v299_v28  ;;  %v120_v62 = vand.u32 2147483648, %v297_v27  ;;  %vm129_vm8 = vcmp.eq.f32.partialorder %v299_v28, inf  ;;  %vm131_vm9 = vcmp.eq.f32.partialorder %v299_v28, 0.0 }
  0x1a   :  { %185 = vrsqrt.f32 %v302_v29  ;;  %v132_v9 = vand.u32 2147483648, %v299_v28  ;;  %vm141_vm10 = vcmp.eq.f32.partialorder %v302_v29, inf  ;;  %v144_v23 = vand.u32 2147483648, %v302_v29 }
  0x1b   :  { %v176_v30 = vpop.eup %175  ;;  %vm143_vm11 = vcmp.eq.f32.partialorder %v302_v29, 0.0 }
  0x1c   :  { %v178_v31 = vpop.eup %177  ;;  %v75_v32 = vmul.f32 %v176_v30, %v291_v24 }
  0x1d   :  { %v180_v33 = vpop.eup %179  ;;  %v87_v34 = vmul.f32 %v178_v31, %v293_v25 }
  0x1e   :  { %v182_v35 = vpop.eup %181  ;;  %v76_v36 = vmul.f32 %v176_v30, %v75_v32  ;;  %v99_v38 = vmul.f32 %v180_v33, %v295_v26 }
  0x1f   :  { %v184_v39 = vpop.eup %183  ;;  %v88_v40 = vmul.f32 %v178_v31, %v87_v34  ;;  %v111_v42 = vmul.f32 %v182_v35, %v297_v27 }
  0x20   :  { %v186_v43 = vpop.eup %185  ;;  %v77_v44 = vmul.f32 0.5, %v76_v36  ;;  %v100_v45 = vmul.f32 %v180_v33, %v99_v38  ;;  %v123_v46 = vmul.f32 %v184_v39, %v299_v28 }
  0x21   :  { %v89_v47 = vmul.f32 0.5, %v88_v40  ;;  %v112_v48 = vmul.f32 %v182_v35, %v111_v42  ;;  %v135_v49 = vmul.f32 %v186_v43, %v302_v29 }
  0x22   :  { %v78_v50 = vsub.f32 1.5, %v77_v44  ;;  %v101_v51 = vmul.f32 0.5, %v100_v45  ;;  %v124_v53 = vmul.f32 %v184_v39, %v123_v46 }
  0x23   :  { %v90_v54 = vsub.f32 1.5, %v89_v47  ;;  %v113_v55 = vmul.f32 0.5, %v112_v48  ;;  %v136_v56 = vmul.f32 %v186_v43, %v135_v49 }
  0x24   :  { %v79_v57 = vmul.f32 %v176_v30, %v78_v50  ;;  %v102_v58 = vsub.f32 1.5, %v101_v51  ;;  %v125_v59 = vmul.f32 0.5, %v124_v53 }
  0x25   :  { %v91_v60 = vmul.f32 %v178_v31, %v90_v54  ;;  %v114_v61 = vsub.f32 1.5, %v113_v55  ;;  %v137_v63 = vmul.f32 0.5, %v136_v56 }
  0x26   :  { %v80_v0 = vmul.f32 %v79_v57, %v291_v24  ;;  %v103_v1 = vmul.f32 %v180_v33, %v102_v58  ;;  %v126_v2 = vsub.f32 1.5, %v125_v59 }
  0x27   :  { %v92_v3 = vmul.f32 %v91_v60, %v293_v25  ;;  %v115_v4 = vmul.f32 %v182_v35, %v114_v61  ;;  %v138_v5 = vsub.f32 1.5, %v137_v63 }
  0x28   :  { %v82_v6 = vsel %vm81_vm0, %v291_v24, %v80_v0  ;;  %v104_v7 = vmul.f32 %v103_v1, %v295_v26  ;;  %v127_v8 = vmul.f32 %v184_v39, %v126_v2 }
  0x29   :  { %v85_v10 = vsel %vm83_vm1, %v84_v37, %v82_v6  ;;  %v94_v11 = vsel %vm93_vm2, %v293_v25, %v92_v3  ;;  %v116_v12 = vmul.f32 %v115_v4, %v297_v27  ;;  %v139_v13 = vmul.f32 %v186_v43, %v138_v5 }
  0x2a   :  { %v97_v14 = vsel %vm95_vm3, %v96_v41, %v94_v11  ;;  %v106_v15 = vsel %vm105_vm4, %v295_v26, %v104_v7  ;;  %v128_v16 = vmul.f32 %v127_v8, %v299_v28 }
  0x2b   :  { %v109_v17 = vsel %vm107_vm5, %v108_v52, %v106_v15  ;;  %v118_v18 = vsel %vm117_vm6, %v297_v27, %v116_v12  ;;  %v140_v19 = vmul.f32 %v139_v13, %v302_v29  ;;  %v146_v20 = vadd.f32 %v97_v14, %v85_v10 }
  0x2c   :  { %v121_v21 = vsel %vm119_vm7, %v120_v62, %v118_v18  ;;  %v130_v22 = vsel %vm129_vm8, %v299_v28, %v128_v16 }
  0x2d   :  { %v142_v24 = vsel %vm141_vm10, %v302_v29, %v140_v19  ;;  %v147_v25 = vadd.f32 %v146_v20, %v109_v17  ;;  %v133_v26 = vsel %vm131_vm9, %v132_v9, %v130_v22 }
  0x2e   :  { %v145_v31 = vsel %vm143_vm11, %v144_v23, %v142_v24 }
  0x2f   :  { %v148_v30 = vadd.f32 %v147_v25, %v121_v21 }
  0x31   :  { %v149_v27 = vadd.f32 %v148_v30, %v133_v26 }
  0x33   :  { %v150_v32 = vadd.f32 %v149_v27, %v145_v31 }
  0x35   :  { %151 = vst [vmem:[#allocation7] sm:$0xff] %v150_v32 }
  0x36   :  { %162 = dma.vmem_to_hbm [thread:$0]  %s158_s1, 128, %s160_s23, [#allocation4]  }
  0x37   :  { %263 = dma.done.wait [#allocation4], 128  }
  0x38   :  { %264 = vsyncadd [#allocation4], 4294967168 }
  0x39   :  { %167 = vsyncpa [#allocation3], 1 }
  0x3a   :  { %168 = vsyncpa [#allocation6], 1 }
  0x3b   :  { %169 = vsyncpa [#allocation4], 1 }

</bundles_post_ra>
